<compile_context>
chip_gen: v5e
topology: v5e:2x2
jax: 0.10.0
libtpu: 0.0.40
codegen_flags: <defaults>
</compile_context>

<pallas_src>
import functools

import jax
import jax.numpy as jnp
import numpy as np
from jax.experimental import pallas as pl
from jax.experimental.pallas import tpu as pltpu


def tinynn_kernel(x_ref, w1_ref, b1_ref, w2_ref, b2_ref, w3_ref, b3_ref,
                  o_ref, *, non_linear: bool):
    # x tile: (TB, in_dim) bf16; weights bf16 (VMEM-resident); biases f32.
    x = x_ref[...]

    # layer1: x @ W1 + b1   (bf16 MXU inputs, f32 accumulation)
    h = jnp.dot(x, w1_ref[...], preferred_element_type=jnp.float32) + b1_ref[...]
    if non_linear:
        h = jnp.maximum(h, 0.0)

    # layer2: h @ W2 + b2
    h = jnp.dot(h.astype(jnp.bfloat16), w2_ref[...],
                preferred_element_type=jnp.float32) + b2_ref[...]
    if non_linear:
        h = jnp.maximum(h, 0.0)

    # layer3: h @ W3 + b3, then Tanh (EUP, f32)
    h = jnp.dot(h.astype(jnp.bfloat16), w3_ref[...],
                preferred_element_type=jnp.float32) + b3_ref[...]
    o_ref[...] = jnp.tanh(h).astype(o_ref.dtype)


def tinynn_forward(x, params, *, non_linear=True, tile_b=512):
    """x: (B, in_dim) float32. params: dict of w1,b1,w2,b2,w3,b3 (f32)."""
    B, in_dim = x.shape
    out_dim = params["w3"].shape[1]

    # Batch tile: multiple of 8 sublanes, capped at tile_b rows per grid step.
    TB = min(tile_b, max(8, ((B + 7) // 8) * 8))
    n_steps = pl.cdiv(B, TB)
    B_pad = TB * n_steps

    # bf16 activations / weights for the MXU; biases stay f32.
    x_bf16 = x.astype(jnp.bfloat16)
    if B_pad != B:
        x_bf16 = jnp.pad(x_bf16, ((0, B_pad - B), (0, 0)))
    w1 = params["w1"].astype(jnp.bfloat16)
    w2 = params["w2"].astype(jnp.bfloat16)
    w3 = params["w3"].astype(jnp.bfloat16)
    b1 = params["b1"].astype(jnp.float32)
    b2 = params["b2"].astype(jnp.float32)
    b3 = params["b3"].astype(jnp.float32)

    kernel = functools.partial(tinynn_kernel, non_linear=non_linear)

    # Constant-index specs: loaded once, resident in VMEM for the whole grid.
    const = lambda arr: pl.BlockSpec(arr.shape, lambda i: (0, 0))

    out = pl.pallas_call(
        kernel,
        out_shape=jax.ShapeDtypeStruct((B_pad, out_dim), jnp.float32),
        grid_spec=pltpu.PrefetchScalarGridSpec(
            num_scalar_prefetch=0,
            grid=(n_steps,),
            in_specs=[
                pl.BlockSpec((TB, in_dim), lambda i: (i, 0)),   # x tile
                const(w1), const(b1),
                const(w2), const(b2),
                const(w3), const(b3),
            ],
            out_specs=pl.BlockSpec((TB, out_dim), lambda i: (i, 0)),
        ),
        compiler_params=pltpu.CompilerParams(
            dimension_semantics=("parallel",),   # shard batch over TCs on v7x
            vmem_limit_bytes=32 * 1024 * 1024,   # explicit; safe on v5e/v6e/v7x
        ),
    )(x_bf16, w1, b1, w2, b2, w3, b3)

    return out[:B] if B_pad != B else out


def init_params(key, in_dim, mid_dim, out_dim):
    """Deterministic init mirroring TinyNN.__init__ (weights stored transposed)."""
    k = jax.random.split(key, 6)
    w1 = jax.random.normal(k[0], (in_dim, mid_dim), jnp.float32) * np.sqrt(2.0 / in_dim)
    w2 = jax.random.normal(k[1], (mid_dim, mid_dim), jnp.float32) * np.sqrt(2.0 / mid_dim)
    w3 = jax.random.normal(k[2], (mid_dim, out_dim), jnp.float32) * np.sqrt(1.0 / mid_dim)
    b1 = jax.random.uniform(k[3], (1, mid_dim), jnp.float32,
                            -1.0 / np.sqrt(in_dim), 1.0 / np.sqrt(in_dim))
    b2 = jax.random.uniform(k[4], (1, mid_dim), jnp.float32,
                            -1.0 / np.sqrt(mid_dim), 1.0 / np.sqrt(mid_dim))
    b3 = jax.random.uniform(k[5], (1, out_dim), jnp.float32,
                            -1.0 / np.sqrt(mid_dim), 1.0 / np.sqrt(mid_dim))
    return dict(w1=w1, b1=b1, w2=w2, b2=b2, w3=w3, b3=b3)


def tinynn_ref_f32(x, p, non_linear=True):
    h = x @ p["w1"] + p["b1"]
    if non_linear:
        h = jnp.maximum(h, 0.0)
    h = h @ p["w2"] + p["b2"]
    if non_linear:
        h = jnp.maximum(h, 0.0)
    h = h @ p["w3"] + p["b3"]
    return jnp.tanh(h)


def tinynn_ref_bf16(x, p, non_linear=True):
    """Reference with the same bf16-matmul / f32-accumulate numerics as the kernel."""
    bf = jnp.bfloat16
    h = jnp.dot(x.astype(bf), p["w1"].astype(bf),
                preferred_element_type=jnp.float32) + p["b1"]
    if non_linear:
        h = jnp.maximum(h, 0.0)
    h = jnp.dot(h.astype(bf), p["w2"].astype(bf),
                preferred_element_type=jnp.float32) + p["b2"]
    if non_linear:
        h = jnp.maximum(h, 0.0)
    h = jnp.dot(h.astype(bf), p["w3"].astype(bf),
                preferred_element_type=jnp.float32) + p["b3"]
    return jnp.tanh(h)


if __name__ == "__main__":
    in_dim, mid_dim, out_dim = 8, 32, 8

    key = jax.random.PRNGKey(0)
    kx_small, kx_big, kp = jax.random.split(key, 3)
    params = init_params(kp, in_dim, mid_dim, out_dim)

    # Small case (single tile), test both non_linear settings.
    x_small = jax.random.normal(kx_small, (8, in_dim), jnp.float32)
    for nl in (True, False):
        out = jax.block_until_ready(tinynn_forward(x_small, params, non_linear=nl))
        # strict check vs a reference with matching bf16-matmul numerics
        np.testing.assert_allclose(
            np.asarray(out), np.asarray(tinynn_ref_bf16(x_small, params, nl)),
            rtol=1e-3, atol=1e-3)
        # loose sanity check vs the pure-f32 reference (bf16 matmul rounding)
        np.testing.assert_allclose(
            np.asarray(out), np.asarray(tinynn_ref_f32(x_small, params, nl)),
            rtol=1e-1, atol=1e-1)

    # Larger case: exercises the batch grid, resident weights, and the
    # pad-to-tile remainder path (1000 -> 2 steps of TB=512).
    x_big = jax.random.normal(kx_big, (1000, in_dim), jnp.float32)
    out_big = jax.block_until_ready(tinynn_forward(x_big, params, non_linear=True))
    np.testing.assert_allclose(
        np.asarray(out_big), np.asarray(tinynn_ref_bf16(x_big, params, True)),
        rtol=1e-3, atol=1e-3)

    print("KERNEL_OK")
</pallas_src>

<mosaic_0001>
module attributes {stable_mosaic.version = 11 : i64} {
  func.func @tinynn_kernel(%arg0: i32, %arg1: memref<8x8xbf16, #tpu.memory_space<vmem>>, %arg2: memref<8x32xbf16, #tpu.memory_space<vmem>>, %arg3: memref<1x32xf32, #tpu.memory_space<vmem>>, %arg4: memref<32x32xbf16, #tpu.memory_space<vmem>>, %arg5: memref<1x32xf32, #tpu.memory_space<vmem>>, %arg6: memref<32x8xbf16, #tpu.memory_space<vmem>>, %arg7: memref<1x8xf32, #tpu.memory_space<vmem>>, %arg8: memref<8x8xf32, #tpu.memory_space<vmem>>) attributes {dimension_semantics = [#tpu.dimension_semantics<parallel>], iteration_bounds = array<i64: 1>, scalar_prefetch = 0 : i64, scratch_operands = 0 : i64, tpu.core_type = #tpu.core_type<tc>, window_params = [{transform_indices = @transform_0, window_bounds = array<i64: 8, 8>}, {pipeline_mode = #tpu.pipeline_mode<synchronous>, transform_indices = @transform_1, window_bounds = array<i64: 8, 32>}, {pipeline_mode = #tpu.pipeline_mode<synchronous>, transform_indices = @transform_2, window_bounds = array<i64: 1, 32>}, {pipeline_mode = #tpu.pipeline_mode<synchronous>, transform_indices = @transform_3, window_bounds = array<i64: 32, 32>}, {pipeline_mode = #tpu.pipeline_mode<synchronous>, transform_indices = @transform_4, window_bounds = array<i64: 1, 32>}, {pipeline_mode = #tpu.pipeline_mode<synchronous>, transform_indices = @transform_5, window_bounds = array<i64: 32, 8>}, {pipeline_mode = #tpu.pipeline_mode<synchronous>, transform_indices = @transform_6, window_bounds = array<i64: 1, 8>}, {transform_indices = @transform_7, window_bounds = array<i64: 8, 8>}]} {
    %c0 = arith.constant 0 : index
    %c0_0 = arith.constant 0 : index
    %0 = vector.load %arg1[%c0, %c0_0] : memref<8x8xbf16, #tpu.memory_space<vmem>>, vector<8x8xbf16>
    %c0_1 = arith.constant 0 : index
    %c0_2 = arith.constant 0 : index
    %1 = vector.load %arg2[%c0_1, %c0_2] : memref<8x32xbf16, #tpu.memory_space<vmem>>, vector<8x32xbf16>
    %cst = arith.constant dense<0.000000e+00> : vector<8x32xf32>
    %2 = tpu.matmul %0, %1, %cst {dimension_numbers = #tpu.dot_dimension_numbers<[1], [0], [0], [1], [0, 0, 1, 1], [], []>} : vector<8x8xbf16>, vector<8x32xbf16>, vector<8x32xf32> -> vector<8x32xf32>
    %c0_3 = arith.constant 0 : index
    %c0_4 = arith.constant 0 : index
    %3 = vector.load %arg3[%c0_3, %c0_4] : memref<1x32xf32, #tpu.memory_space<vmem>>, vector<1x32xf32>
    %4 = vector.broadcast %3 : vector<1x32xf32> to vector<8x32xf32>
    %5 = arith.addf %2, %4 : vector<8x32xf32>
    %cst_5 = arith.constant 0.000000e+00 : f32
    %6 = vector.broadcast %cst_5 : f32 to vector<8x32xf32>
    %7 = arith.maximumf %5, %6 : vector<8x32xf32>
    %8 = arith.truncf %7 : vector<8x32xf32> to vector<8x32xbf16>
    %c0_6 = arith.constant 0 : index
    %c0_7 = arith.constant 0 : index
    %9 = vector.load %arg4[%c0_6, %c0_7] : memref<32x32xbf16, #tpu.memory_space<vmem>>, vector<32x32xbf16>
    %cst_8 = arith.constant dense<0.000000e+00> : vector<8x32xf32>
    %10 = tpu.matmul %8, %9, %cst_8 {dimension_numbers = #tpu.dot_dimension_numbers<[1], [0], [0], [1], [0, 0, 1, 1], [], []>} : vector<8x32xbf16>, vector<32x32xbf16>, vector<8x32xf32> -> vector<8x32xf32>
    %c0_9 = arith.constant 0 : index
    %c0_10 = arith.constant 0 : index
    %11 = vector.load %arg5[%c0_9, %c0_10] : memref<1x32xf32, #tpu.memory_space<vmem>>, vector<1x32xf32>
    %12 = vector.broadcast %11 : vector<1x32xf32> to vector<8x32xf32>
    %13 = arith.addf %10, %12 : vector<8x32xf32>
    %cst_11 = arith.constant 0.000000e+00 : f32
    %14 = vector.broadcast %cst_11 : f32 to vector<8x32xf32>
    %15 = arith.maximumf %13, %14 : vector<8x32xf32>
    %16 = arith.truncf %15 : vector<8x32xf32> to vector<8x32xbf16>
    %c0_12 = arith.constant 0 : index
    %c0_13 = arith.constant 0 : index
    %17 = vector.load %arg6[%c0_12, %c0_13] : memref<32x8xbf16, #tpu.memory_space<vmem>>, vector<32x8xbf16>
    %cst_14 = arith.constant dense<0.000000e+00> : vector<8x8xf32>
    %18 = tpu.matmul %16, %17, %cst_14 {dimension_numbers = #tpu.dot_dimension_numbers<[1], [0], [0], [1], [0, 0, 1, 1], [], []>} : vector<8x32xbf16>, vector<32x8xbf16>, vector<8x8xf32> -> vector<8x8xf32>
    %c0_15 = arith.constant 0 : index
    %c0_16 = arith.constant 0 : index
    %19 = vector.load %arg7[%c0_15, %c0_16] : memref<1x8xf32, #tpu.memory_space<vmem>>, vector<1x8xf32>
    %20 = vector.broadcast %19 : vector<1x8xf32> to vector<8x8xf32>
    %21 = arith.addf %18, %20 : vector<8x8xf32>
    %22 = math.tanh %21 : vector<8x8xf32>
    %c0_17 = arith.constant 0 : index
    %c0_18 = arith.constant 0 : index
    %23 = vector.load %arg8[%c0_17, %c0_18] : memref<8x8xf32, #tpu.memory_space<vmem>>, vector<8x8xf32>
    tpu.vector_store %arg8[%c0_17, %c0_18], %22 {strides = array<i32>} : memref<8x8xf32, #tpu.memory_space<vmem>>, vector<8x8xf32>,
    return
  }
  func.func @transform_0(%arg0: i32) -> (i32, i32) {
    %c0_i32 = arith.constant 0 : i32
    %c0_i32_0 = arith.constant 0 : i32
    return %arg0, %c0_i32 : i32, i32
  }
  func.func @transform_1(%arg0: i32) -> (i32, i32) {
    %c0_i32 = arith.constant 0 : i32
    %c0_i32_0 = arith.constant 0 : i32
    %c0_i32_1 = arith.constant 0 : i32
    return %c0_i32, %c0_i32_0 : i32, i32
  }
  func.func @transform_2(%arg0: i32) -> (i32, i32) {
    %c0_i32 = arith.constant 0 : i32
    %c0_i32_0 = arith.constant 0 : i32
    %c0_i32_1 = arith.constant 0 : i32
    return %c0_i32, %c0_i32_0 : i32, i32
  }
  func.func @transform_3(%arg0: i32) -> (i32, i32) {
    %c0_i32 = arith.constant 0 : i32
    %c0_i32_0 = arith.constant 0 : i32
    %c0_i32_1 = arith.constant 0 : i32
    return %c0_i32, %c0_i32_0 : i32, i32
  }
  func.func @transform_4(%arg0: i32) -> (i32, i32) {
    %c0_i32 = arith.constant 0 : i32
    %c0_i32_0 = arith.constant 0 : i32
    %c0_i32_1 = arith.constant 0 : i32
    return %c0_i32, %c0_i32_0 : i32, i32
  }
  func.func @transform_5(%arg0: i32) -> (i32, i32) {
    %c0_i32 = arith.constant 0 : i32
    %c0_i32_0 = arith.constant 0 : i32
    %c0_i32_1 = arith.constant 0 : i32
    return %c0_i32, %c0_i32_0 : i32, i32
  }
  func.func @transform_6(%arg0: i32) -> (i32, i32) {
    %c0_i32 = arith.constant 0 : i32
    %c0_i32_0 = arith.constant 0 : i32
    %c0_i32_1 = arith.constant 0 : i32
    return %c0_i32, %c0_i32_0 : i32, i32
  }
  func.func @transform_7(%arg0: i32) -> (i32, i32) {
    %c0_i32 = arith.constant 0 : i32
    %c0_i32_0 = arith.constant 0 : i32
    return %arg0, %c0_i32 : i32, i32
  }
}

</mosaic_0001>

<bundles_post_ra>
// kernel: tpu_custom_call.1
= control target key start
LH: loop header
LB: loop body
LE: loop exit
PB: predicated region body
PF: predicated region fallthrough
CT: control target
= control target key end

     0   :  { %12 = vsyncpa [#allocation3], 0  ;;  %s403_s0 = inlined_call_operand.vmem [shape: bf16[8,8], index: 0, kind: input, shape index: {}]   ;;  %s404_s1 = inlined_call_operand.hbm [shape: bf16[8,32], index: 1, kind: input, shape index: {}]   ;;  %s405_s2 = inlined_call_operand.hbm [shape: f32[1,32], index: 2, kind: input, shape index: {}]   ;;  %s406_s3 = inlined_call_operand.vmem [shape: bf16[32,32], index: 3, kind: input, shape index: {}]   ;;  %s407_s4 = inlined_call_operand.hbm [shape: f32[1,32], index: 4, kind: input, shape index: {}]   ;;  %s408_s5 = inlined_call_operand.vmem [shape: bf16[32,8], index: 5, kind: input, shape index: {}]   ;;  %s409_s6 = inlined_call_operand.vmem [shape: f32[1,8], index: 6, kind: input, shape index: {}]   ;;  %s410_s7 = inlined_call_operand.hbm [shape: f32[8,8], index: 7, kind: output, shape index: {}]  }
   0x1   :  { %13 = vsyncpa [#allocation6], 0  ;;  %s33_s26 = sshll.u32 %s405_s2, 4  ;;  %s34_s26 = int_to_ptr.hbm [resolvable:$true] %s33_s26 }
   0x2   :  { %14 = vsyncpa [#allocation4], 0  ;;  %s327_s27 = smov [#allocation5]   ;;  %s22_s8 = sshll.u32 %s404_s1, 4  ;;  %s23_s8 = int_to_ptr.hbm [resolvable:$true] %s22_s8 }
   0x3   :  { %s35_s28 = sshll.u32 %s327_s27, 4  ;;  %s328_s9 = smov [#allocation2]   ;;  %s36_s28 = int_to_ptr.vmem [resolvable:$true] %s35_s28 }
   0x4   :  { %38 = dma.hbm_to_vmem [thread:$0]  %s34_s26, 16, %s36_s28, [#allocation6]  }
   0x5   :  { %s24_s10 = sshll.u32 %s328_s9, 4  ;;  %s46_s13 = sshll.u32 %s407_s4, 4  ;;  %s25_s10 = int_to_ptr.vmem [resolvable:$true] %s24_s10  ;;  %s47_s13 = int_to_ptr.hbm [resolvable:$true] %s46_s13 }
   0x6   :  { %27 = dma.hbm_to_vmem [thread:$0]  %s23_s8, 64, %s25_s10, [#allocation3]  }
   0x7   :  { %s329_s2 = smov [#allocation7]  }
   0x8   :  { %s48_s14 = sshll.u32 %s329_s2, 4  ;;  %s49_s14 = int_to_ptr.vmem [resolvable:$true] %s48_s14 }
   0x9   :  { %51 = dma.hbm_to_vmem [thread:$0]  %s47_s13, 16, %s49_s14, [#allocation6]  }
   0xa   :  { %321 = dma.done.wait [#allocation3], 64  }
   0xb   :  { %322 = vsyncadd [#allocation3], 4294967232 }
   0xc   :  { %323 = dma.done.wait [#allocation6], 32  }
   0xd   :  { %324 = vsyncadd [#allocation6], 4294967264  ;;  %vm79_vm0 = vcmask 1043456   ;;  %v70_v0 = vld [vmem:[#allocation2] sm:$0xf]  ;;  %vm75_vm1 = vcmask 64512  }
   0xe   :  { %v81_v1 = vsel %vm79_vm0, %v70_v0, 0  ;;  %v69_v2 = vld [vmem:[%s403_s0] sm:$0xf]  ;;  %v213_v3 = vld [vmem:[%s406_s3 + $0x8] sm:$0xff]  ;;  %v220_v5 = vld [vmem:[#allocation5] ss:$0 sm:$0xff] }
   0xf   :  { %90 = vmatpush.bf16.msra.mxu0 %v81_v1  ;;  %128 = vmatpush.bf16.msra.mxu1 %v213_v3  ;;  %v212_v4 = vld [vmem:[%s406_s3] sm:$0xff]  ;;  %vm118_vm2 = vcmask 261120   ;;  %v215_v11 = vld [vmem:[%s408_s5 + $0x8] sm:$0xff]  ;;  %s330_s23 = smov [#allocation8]  }
  0x10   :  { %166 = vmatpush.bf16.msra.mxu2 %v215_v11  ;;  %v214_v12 = vld [vmem:[%s408_s5] sm:$0xff]  ;;  %s180_s24 = sshll.u32 %s330_s23, 4  ;;  %s182_s5 = sshll.u32 %s410_s7, 4  ;;  %s181_s24 = int_to_ptr.vmem [resolvable:$true] %s180_s24  ;;  %s183_s5 = int_to_ptr.hbm [resolvable:$true] %s182_s5 }
  0x11   :  { %v221_v13 = vld [vmem:[#allocation7] ss:$0 sm:$0xff]  ;;  %v222_v19 = vld [vmem:[%s409_s6] ss:$0 sm:$0xff] }
  0x12   :  { %193 = vmatmul.msk.bf16.vlgmr.msra.gmra.mxu0 %vm75_vm1, %v69_v2 }
  0x13   :  { %129 = vmatpush.bf16.msra.mxu1 %v212_v4 }
  0x14   :  { %167 = vmatpush.bf16.msra.mxu2 %v214_v12 }
  0x8f   :  { %v92_v6 = vpop.f32.mrf.mxu0 }
  0x90   :  { %v93_v7 = vadd.f32 %v220_v5, %v92_v6 }
  0x92   :  { %v96_v8 = vmax.f32 %v93_v7, 0.0 }
  0x94   :  { %v97_v9 = vpack.c.bf16 %v96_v8, %v96_v8 }
  0x96   :  { %202 = vmatmul.msk.bf16.vlgmr.msra.gmra.mxu1 %vm118_vm2, %v97_v9 }
  0x97   :  { %v94_v10 = vpop.f32.mrf.mxu0 }
 0x113   :  { %v131_v14 = vpop.f32.mrf.mxu1 }
 0x114   :  { %v132_v15 = vadd.f32 %v221_v13, %v131_v14 }
 0x116   :  { %v135_v16 = vmax.f32 %v132_v15, 0.0 }
 0x118   :  { %v136_v17 = vpack.c.bf16 %v135_v16, %v135_v16 }
 0x11a   :  { %211 = vmatmul.msk.bf16.vlgmr.msra.gmra.mxu2 %vm118_vm2, %v136_v17 }
 0x11b   :  { %v133_v18 = vpop.f32.mrf.mxu1 }
 0x19d   :  { %v169_v20 = vpop.f32.mrf.mxu2 }
 0x19e   :  { %v170_v21 = vadd.f32 %v222_v19, %v169_v20 }
 0x1a0   :  { %223 = vtanh.f32 %v170_v21 }
 0x1a5   :  { %v171_v22 = vpop.f32.mrf.mxu2 }
 0x1a6   :  { %v224_v23 = vpop.eup %223 }
 0x1a7   :  { %174 = vst.msk [vmem:[#allocation8] sm:$0xff] %vm75_vm1, %v224_v23 }
 0x1a8   :  { %185 = dma.vmem_to_hbm [thread:$0]  %s181_s24, 128, %s183_s5, [#allocation4]  }
 0x1a9   :  { %325 = dma.done.wait [#allocation4], 128  }
 0x1aa   :  { %326 = vsyncadd [#allocation4], 4294967168 }
 0x1ab   :  { %190 = vsyncpa [#allocation3], 1 }
 0x1ac   :  { %191 = vsyncpa [#allocation6], 1 }
 0x1ad   :  { %192 = vsyncpa [#allocation4], 1 }

</bundles_post_ra>
